<compile_context>
chip_gen: v5e
topology: v5e:2x2
jax: 0.10.0
libtpu: 0.0.40
codegen_flags: <defaults>
</compile_context>

<pallas_src>
import jax
import jax.numpy as jnp
from jax.experimental import pallas as pl
from jax.experimental.pallas import tpu as pltpu


def _round_up(n, m):
    return ((n + m - 1) // m) * m


def _gru_layer_kernel(
    x_ref, h_ref,            # activations: [TB, I_pad], [TB, H_pad]
    wi_ref, wh_ref,          # fused gate weights: [I_pad, 3*H_pad], [H_pad, 3*H_pad]
    bi_ref, bh_ref,          # fused gate biases: [1, 3*H_pad]
    w1_ref, b1_ref,          # output_transform Linear1: [H_pad, H_pad], [1, H_pad]
    w2_ref, b2_ref,          # output_transform Linear2: [H_pad, O_pad], [1, O_pad]
    g_ref, h_out_ref,        # outputs: [TB, O_pad], [TB, H_pad]
):
    Hp = h_ref.shape[-1]

    x = x_ref[...]
    h = h_ref[...]

    # Fused gate projections; MXU consumes native dtype, accumulates in f32.
    gi = jnp.dot(x, wi_ref[...], preferred_element_type=jnp.float32) + bi_ref[...]
    gh = jnp.dot(h, wh_ref[...], preferred_element_type=jnp.float32) + bh_ref[...]

    # PyTorch nn.GRUCell semantics (gate order r, z, n).  Slices fall on 128-lane
    # boundaries because Hp is a multiple of 128.  sigmoid/tanh lower to the EUP.
    r = jax.nn.sigmoid(gi[:, 0:Hp] + gh[:, 0:Hp])
    z = jax.nn.sigmoid(gi[:, Hp:2 * Hp] + gh[:, Hp:2 * Hp])
    n = jnp.tanh(gi[:, 2 * Hp:3 * Hp] + r * gh[:, 2 * Hp:3 * Hp])
    # (1 - z) * n + z * h  ==  n + z * (h - n)   (one fewer VPU op)
    h_new = n + z * (h.astype(jnp.float32) - n)

    # output_transform: Linear(H, H) -> Tanh -> Linear(H, O)
    hid = jnp.tanh(
        jnp.dot(h_new.astype(w1_ref.dtype), w1_ref[...],
                preferred_element_type=jnp.float32) + b1_ref[...])
    g = jnp.dot(hid.astype(w2_ref.dtype), w2_ref[...],
                preferred_element_type=jnp.float32) + b2_ref[...]

    h_out_ref[...] = h_new.astype(h_out_ref.dtype)
    g_ref[...] = g.astype(g_ref.dtype)


def prepare_params(params, input_size, hidden_size, output_size):
    """One-time prep: split/transpose/fuse/pad PyTorch-layout GRU weights.

    Padded rows/columns are zero, chosen so that padded lanes of h_new and g
    come out exactly zero in the kernel.
    """
    H, I, O = hidden_size, input_size, output_size
    I_pad = _round_up(I, 128)
    H_pad = _round_up(H, 128)
    O_pad = _round_up(O, 128)

    def pad2(a, rows, cols):
        return jnp.pad(a, ((0, rows - a.shape[0]), (0, cols - a.shape[1])))

    def pad1(a, cols):
        return jnp.pad(a, (0, cols - a.shape[0]))

    w_ih, w_hh = params["weight_ih"], params["weight_hh"]   # [3H, I], [3H, H]
    b_ih, b_hh = params["bias_ih"], params["bias_hh"]       # [3H], [3H]

    # Fused, transposed, padded gate weights: columns [0:Hp]=r, [Hp:2Hp]=z, [2Hp:3Hp]=n.
    wi_cat = jnp.concatenate(
        [pad2(w_ih[k * H:(k + 1) * H].T, I_pad, H_pad) for k in range(3)], axis=1)
    wh_cat = jnp.concatenate(
        [pad2(w_hh[k * H:(k + 1) * H].T, H_pad, H_pad) for k in range(3)], axis=1)
    bi_cat = jnp.concatenate(
        [pad1(b_ih[k * H:(k + 1) * H], H_pad) for k in range(3)])[None, :]
    bh_cat = jnp.concatenate(
        [pad1(b_hh[k * H:(k + 1) * H], H_pad) for k in range(3)])[None, :]

    w1 = pad2(params["w_out1"].T, H_pad, H_pad)
    b1 = pad1(params["b_out1"], H_pad)[None, :]
    w2 = pad2(params["w_out2"].T, H_pad, O_pad)
    b2 = pad1(params["b_out2"], O_pad)[None, :]

    return {
        "wi": wi_cat, "wh": wh_cat, "bi": bi_cat, "bh": bh_cat,
        "w1": w1, "b1": b1, "w2": w2, "b2": b2,
        "dims": (I, H, O, I_pad, H_pad, O_pad),
    }


def custom_gru_layer(x, h_t, prepared):
    """Forward matching CustomGRULayer.forward(x, h_t) -> (g_t, h_t_new)."""
    I, H, O, I_pad, H_pad, O_pad = prepared["dims"]
    B = x.shape[0]
    dtype = x.dtype

    # Batch tile: one tile padded to 8 sublanes for small B, 256-row tiles for large B
    # (amortizes per-grid-step overhead while bounding batch-padding waste).
    TB = min(_round_up(B, 8), 256)
    B_pad = _round_up(B, TB)
    nb = B_pad // TB

    x_p = jnp.pad(x, ((0, B_pad - B), (0, I_pad - I)))
    h_p = jnp.pad(h_t, ((0, B_pad - B), (0, H_pad - H)))

    def act_spec(cols):
        return pl.BlockSpec((TB, cols), lambda i: (i, 0))

    def const_spec(shape):
        # Constant block index -> weight DMA'd once, stays VMEM-resident across the grid.
        return pl.BlockSpec(shape, lambda i: (0, 0))

    g_p, h_new_p = pl.pallas_call(
        _gru_layer_kernel,
        out_shape=(
            jax.ShapeDtypeStruct((B_pad, O_pad), dtype),
            jax.ShapeDtypeStruct((B_pad, H_pad), dtype),
        ),
        grid=(nb,),
        in_specs=[
            act_spec(I_pad),                     # x
            act_spec(H_pad),                     # h
            const_spec((I_pad, 3 * H_pad)),      # wi
            const_spec((H_pad, 3 * H_pad)),      # wh
            const_spec((1, 3 * H_pad)),          # bi
            const_spec((1, 3 * H_pad)),          # bh
            const_spec((H_pad, H_pad)),          # w1
            const_spec((1, H_pad)),              # b1
            const_spec((H_pad, O_pad)),          # w2
            const_spec((1, O_pad)),              # b2
        ],
        out_specs=(act_spec(O_pad), act_spec(H_pad)),
        compiler_params=pltpu.CompilerParams(
            dimension_semantics=("parallel",),
            vmem_limit_bytes=64 * 1024 * 1024,
        ),
    )(x_p, h_p, prepared["wi"], prepared["wh"], prepared["bi"], prepared["bh"],
      prepared["w1"], prepared["b1"], prepared["w2"], prepared["b2"])

    # Strip padding (stores inside the kernel are lane-dense; slicing happens outside).
    return g_p[:B, :O], h_new_p[:B, :H]


def init_params(key, input_size, hidden_size, output_size, dtype=jnp.float32):
    """Deterministic parameter init mirroring nn.GRUCell + two nn.Linear shapes."""
    ks = jax.random.split(key, 8)
    s = 1.0 / jnp.sqrt(hidden_size)
    u = lambda k, shape: jax.random.uniform(k, shape, dtype, minval=-s, maxval=s)
    return {
        "weight_ih": u(ks[0], (3 * hidden_size, input_size)),
        "weight_hh": u(ks[1], (3 * hidden_size, hidden_size)),
        "bias_ih":   u(ks[2], (3 * hidden_size,)),
        "bias_hh":   u(ks[3], (3 * hidden_size,)),
        "w_out1":    u(ks[4], (hidden_size, hidden_size)),
        "b_out1":    u(ks[5], (hidden_size,)),
        "w_out2":    u(ks[6], (output_size, hidden_size)),
        "b_out2":    u(ks[7], (output_size,)),
    }


def _reference(x, h_t, params):
    """Pure-JAX reference for validation (matches nn.GRUCell semantics)."""
    H = params["weight_hh"].shape[1]
    gi = x @ params["weight_ih"].T + params["bias_ih"]
    gh = h_t @ params["weight_hh"].T + params["bias_hh"]
    r = jax.nn.sigmoid(gi[:, 0:H] + gh[:, 0:H])
    z = jax.nn.sigmoid(gi[:, H:2 * H] + gh[:, H:2 * H])
    n = jnp.tanh(gi[:, 2 * H:] + r * gh[:, 2 * H:])
    h_new = (1.0 - z) * n + z * h_t
    hid = jnp.tanh(h_new @ params["w_out1"].T + params["b_out1"])
    g = hid @ params["w_out2"].T + params["b_out2"]
    return g, h_new


if __name__ == "__main__":
    batch, input_size, hidden_size, output_size = 2, 16, 32, 8

    key = jax.random.PRNGKey(0)
    k_x, k_h, k_p = jax.random.split(key, 3)
    x = jax.random.normal(k_x, (batch, input_size), jnp.float32)
    h_t = jax.random.normal(k_h, (batch, hidden_size), jnp.float32)
    params = init_params(k_p, input_size, hidden_size, output_size)

    # One-time weight fusion / padding (hoisted out of the per-step path).
    prepared = prepare_params(params, input_size, hidden_size, output_size)

    g, h_new = custom_gru_layer(x, h_t, prepared)
    jax.block_until_ready((g, h_new))

    g_ref, h_ref = _reference(x, h_t, params)
    assert g.shape == (batch, output_size) and h_new.shape == (batch, hidden_size)
    assert jnp.allclose(g, g_ref, atol=1e-5, rtol=1e-5)
    assert jnp.allclose(h_new, h_ref, atol=1e-5, rtol=1e-5)

    print("KERNEL_OK")
</pallas_src>

<mosaic_0001>
module attributes {stable_mosaic.version = 11 : i64} {
  func.func @_gru_layer_kernel(%arg0: i32, %arg1: memref<8x128xf32, #tpu.memory_space<vmem>>, %arg2: memref<8x128xf32, #tpu.memory_space<vmem>>, %arg3: memref<128x384xf32, #tpu.memory_space<vmem>>, %arg4: memref<128x384xf32, #tpu.memory_space<vmem>>, %arg5: memref<1x384xf32, #tpu.memory_space<vmem>>, %arg6: memref<1x384xf32, #tpu.memory_space<vmem>>, %arg7: memref<128x128xf32, #tpu.memory_space<vmem>>, %arg8: memref<1x128xf32, #tpu.memory_space<vmem>>, %arg9: memref<128x128xf32, #tpu.memory_space<vmem>>, %arg10: memref<1x128xf32, #tpu.memory_space<vmem>>, %arg11: memref<8x128xf32, #tpu.memory_space<vmem>>, %arg12: memref<8x128xf32, #tpu.memory_space<vmem>>) attributes {dimension_semantics = [#tpu.dimension_semantics<parallel>], iteration_bounds = array<i64: 1>, scalar_prefetch = 0 : i64, scratch_operands = 0 : i64, tpu.core_type = #tpu.core_type<tc>, window_params = [{transform_indices = @transform_0, window_bounds = array<i64: 8, 128>}, {transform_indices = @transform_1, window_bounds = array<i64: 8, 128>}, {pipeline_mode = #tpu.pipeline_mode<synchronous>, transform_indices = @transform_2, window_bounds = array<i64: 128, 384>}, {pipeline_mode = #tpu.pipeline_mode<synchronous>, transform_indices = @transform_3, window_bounds = array<i64: 128, 384>}, {pipeline_mode = #tpu.pipeline_mode<synchronous>, transform_indices = @transform_4, window_bounds = array<i64: 1, 384>}, {pipeline_mode = #tpu.pipeline_mode<synchronous>, transform_indices = @transform_5, window_bounds = array<i64: 1, 384>}, {pipeline_mode = #tpu.pipeline_mode<synchronous>, transform_indices = @transform_6, window_bounds = array<i64: 128, 128>}, {pipeline_mode = #tpu.pipeline_mode<synchronous>, transform_indices = @transform_7, window_bounds = array<i64: 1, 128>}, {pipeline_mode = #tpu.pipeline_mode<synchronous>, transform_indices = @transform_8, window_bounds = array<i64: 128, 128>}, {pipeline_mode = #tpu.pipeline_mode<synchronous>, transform_indices = @transform_9, window_bounds = array<i64: 1, 128>}, {transform_indices = @transform_10, window_bounds = array<i64: 8, 128>}, {transform_indices = @transform_11, window_bounds = array<i64: 8, 128>}]} {
    %c0 = arith.constant 0 : index
    %c0_0 = arith.constant 0 : index
    %0 = vector.load %arg1[%c0, %c0_0] : memref<8x128xf32, #tpu.memory_space<vmem>>, vector<8x128xf32>
    %c0_1 = arith.constant 0 : index
    %c0_2 = arith.constant 0 : index
    %1 = vector.load %arg2[%c0_1, %c0_2] : memref<8x128xf32, #tpu.memory_space<vmem>>, vector<8x128xf32>
    %c0_3 = arith.constant 0 : index
    %c0_4 = arith.constant 0 : index
    %2 = vector.load %arg3[%c0_3, %c0_4] : memref<128x384xf32, #tpu.memory_space<vmem>>, vector<128x384xf32>
    %cst = arith.constant dense<0.000000e+00> : vector<8x384xf32>
    %3 = tpu.matmul %0, %2, %cst {dimension_numbers = #tpu.dot_dimension_numbers<[1], [0], [0], [1], [0, 0, 1, 1], [], []>} : vector<8x128xf32>, vector<128x384xf32>, vector<8x384xf32> -> vector<8x384xf32>
    %c0_5 = arith.constant 0 : index
    %c0_6 = arith.constant 0 : index
    %4 = vector.load %arg5[%c0_5, %c0_6] : memref<1x384xf32, #tpu.memory_space<vmem>>, vector<1x384xf32>
    %5 = vector.broadcast %4 : vector<1x384xf32> to vector<8x384xf32>
    %6 = arith.addf %3, %5 : vector<8x384xf32>
    %c0_7 = arith.constant 0 : index
    %c0_8 = arith.constant 0 : index
    %7 = vector.load %arg4[%c0_7, %c0_8] : memref<128x384xf32, #tpu.memory_space<vmem>>, vector<128x384xf32>
    %cst_9 = arith.constant dense<0.000000e+00> : vector<8x384xf32>
    %8 = tpu.matmul %1, %7, %cst_9 {dimension_numbers = #tpu.dot_dimension_numbers<[1], [0], [0], [1], [0, 0, 1, 1], [], []>} : vector<8x128xf32>, vector<128x384xf32>, vector<8x384xf32> -> vector<8x384xf32>
    %c0_10 = arith.constant 0 : index
    %c0_11 = arith.constant 0 : index
    %9 = vector.load %arg6[%c0_10, %c0_11] : memref<1x384xf32, #tpu.memory_space<vmem>>, vector<1x384xf32>
    %10 = vector.broadcast %9 : vector<1x384xf32> to vector<8x384xf32>
    %11 = arith.addf %8, %10 : vector<8x384xf32>
    %12 = vector.extract_strided_slice %6 {offsets = [0, 0], sizes = [8, 128], strides = [1, 1]} : vector<8x384xf32> to vector<8x128xf32>
    %13 = vector.extract_strided_slice %11 {offsets = [0, 0], sizes = [8, 128], strides = [1, 1]} : vector<8x384xf32> to vector<8x128xf32>
    %14 = arith.addf %12, %13 : vector<8x128xf32>
    %15 = arith.negf %14 : vector<8x128xf32>
    %16 = math.exp %15 : vector<8x128xf32>
    %cst_12 = arith.constant 1.000000e+00 : f32
    %17 = vector.broadcast %cst_12 : f32 to vector<8x128xf32>
    %18 = arith.addf %17, %16 : vector<8x128xf32>
    %19 = arith.divf %17, %18 : vector<8x128xf32>
    %20 = vector.extract_strided_slice %6 {offsets = [0, 128], sizes = [8, 128], strides = [1, 1]} : vector<8x384xf32> to vector<8x128xf32>
    %21 = vector.extract_strided_slice %11 {offsets = [0, 128], sizes = [8, 128], strides = [1, 1]} : vector<8x384xf32> to vector<8x128xf32>
    %22 = arith.addf %20, %21 : vector<8x128xf32>
    %23 = arith.negf %22 : vector<8x128xf32>
    %24 = math.exp %23 : vector<8x128xf32>
    %cst_13 = arith.constant 1.000000e+00 : f32
    %25 = vector.broadcast %cst_13 : f32 to vector<8x128xf32>
    %26 = arith.addf %25, %24 : vector<8x128xf32>
    %27 = arith.divf %25, %26 : vector<8x128xf32>
    %28 = vector.extract_strided_slice %6 {offsets = [0, 256], sizes = [8, 128], strides = [1, 1]} : vector<8x384xf32> to vector<8x128xf32>
    %29 = vector.extract_strided_slice %11 {offsets = [0, 256], sizes = [8, 128], strides = [1, 1]} : vector<8x384xf32> to vector<8x128xf32>
    %30 = arith.mulf %19, %29 : vector<8x128xf32>
    %31 = arith.addf %28, %30 : vector<8x128xf32>
    %32 = math.tanh %31 : vector<8x128xf32>
    %33 = arith.subf %1, %32 : vector<8x128xf32>
    %34 = arith.mulf %27, %33 : vector<8x128xf32>
    %35 = arith.addf %32, %34 : vector<8x128xf32>
    %c0_14 = arith.constant 0 : index
    %c0_15 = arith.constant 0 : index
    %36 = vector.load %arg7[%c0_14, %c0_15] : memref<128x128xf32, #tpu.memory_space<vmem>>, vector<128x128xf32>
    %cst_16 = arith.constant dense<0.000000e+00> : vector<8x128xf32>
    %37 = tpu.matmul %35, %36, %cst_16 {dimension_numbers = #tpu.dot_dimension_numbers<[1], [0], [0], [1], [0, 0, 1, 1], [], []>} : vector<8x128xf32>, vector<128x128xf32>, vector<8x128xf32> -> vector<8x128xf32>
    %c0_17 = arith.constant 0 : index
    %c0_18 = arith.constant 0 : index
    %38 = vector.load %arg8[%c0_17, %c0_18] : memref<1x128xf32, #tpu.memory_space<vmem>>, vector<1x128xf32>
    %39 = vector.broadcast %38 : vector<1x128xf32> to vector<8x128xf32>
    %40 = arith.addf %37, %39 : vector<8x128xf32>
    %41 = math.tanh %40 : vector<8x128xf32>
    %c0_19 = arith.constant 0 : index
    %c0_20 = arith.constant 0 : index
    %42 = vector.load %arg9[%c0_19, %c0_20] : memref<128x128xf32, #tpu.memory_space<vmem>>, vector<128x128xf32>
    %cst_21 = arith.constant dense<0.000000e+00> : vector<8x128xf32>
    %43 = tpu.matmul %41, %42, %cst_21 {dimension_numbers = #tpu.dot_dimension_numbers<[1], [0], [0], [1], [0, 0, 1, 1], [], []>} : vector<8x128xf32>, vector<128x128xf32>, vector<8x128xf32> -> vector<8x128xf32>
    %c0_22 = arith.constant 0 : index
    %c0_23 = arith.constant 0 : index
    %44 = vector.load %arg10[%c0_22, %c0_23] : memref<1x128xf32, #tpu.memory_space<vmem>>, vector<1x128xf32>
    %45 = vector.broadcast %44 : vector<1x128xf32> to vector<8x128xf32>
    %46 = arith.addf %43, %45 : vector<8x128xf32>
    %c0_24 = arith.constant 0 : index
    %c0_25 = arith.constant 0 : index
    %47 = vector.load %arg12[%c0_24, %c0_25] : memref<8x128xf32, #tpu.memory_space<vmem>>, vector<8x128xf32>
    tpu.vector_store %arg12[%c0_24, %c0_25], %35 {strides = array<i32>} : memref<8x128xf32, #tpu.memory_space<vmem>>, vector<8x128xf32>,
    %c0_26 = arith.constant 0 : index
    %c0_27 = arith.constant 0 : index
    %48 = vector.load %arg11[%c0_26, %c0_27] : memref<8x128xf32, #tpu.memory_space<vmem>>, vector<8x128xf32>
    tpu.vector_store %arg11[%c0_26, %c0_27], %46 {strides = array<i32>} : memref<8x128xf32, #tpu.memory_space<vmem>>, vector<8x128xf32>,
    return
  }
  func.func @transform_0(%arg0: i32) -> (i32, i32) {
    %c0_i32 = arith.constant 0 : i32
    %c0_i32_0 = arith.constant 0 : i32
    return %arg0, %c0_i32 : i32, i32
  }
  func.func @transform_1(%arg0: i32) -> (i32, i32) {
    %c0_i32 = arith.constant 0 : i32
    %c0_i32_0 = arith.constant 0 : i32
    return %arg0, %c0_i32 : i32, i32
  }
  func.func @transform_2(%arg0: i32) -> (i32, i32) {
    %c0_i32 = arith.constant 0 : i32
    %c0_i32_0 = arith.constant 0 : i32
    %c0_i32_1 = arith.constant 0 : i32
    return %c0_i32, %c0_i32_0 : i32, i32
  }
  func.func @transform_3(%arg0: i32) -> (i32, i32) {
    %c0_i32 = arith.constant 0 : i32
    %c0_i32_0 = arith.constant 0 : i32
    %c0_i32_1 = arith.constant 0 : i32
    return %c0_i32, %c0_i32_0 : i32, i32
  }
  func.func @transform_4(%arg0: i32) -> (i32, i32) {
    %c0_i32 = arith.constant 0 : i32
    %c0_i32_0 = arith.constant 0 : i32
    %c0_i32_1 = arith.constant 0 : i32
    return %c0_i32, %c0_i32_0 : i32, i32
  }
  func.func @transform_5(%arg0: i32) -> (i32, i32) {
    %c0_i32 = arith.constant 0 : i32
    %c0_i32_0 = arith.constant 0 : i32
    %c0_i32_1 = arith.constant 0 : i32
    return %c0_i32, %c0_i32_0 : i32, i32
  }
  func.func @transform_6(%arg0: i32) -> (i32, i32) {
    %c0_i32 = arith.constant 0 : i32
    %c0_i32_0 = arith.constant 0 : i32
    %c0_i32_1 = arith.constant 0 : i32
    return %c0_i32, %c0_i32_0 : i32, i32
  }
  func.func @transform_7(%arg0: i32) -> (i32, i32) {
    %c0_i32 = arith.constant 0 : i32
    %c0_i32_0 = arith.constant 0 : i32
    %c0_i32_1 = arith.constant 0 : i32
    return %c0_i32, %c0_i32_0 : i32, i32
  }
  func.func @transform_8(%arg0: i32) -> (i32, i32) {
    %c0_i32 = arith.constant 0 : i32
    %c0_i32_0 = arith.constant 0 : i32
    %c0_i32_1 = arith.constant 0 : i32
    return %c0_i32, %c0_i32_0 : i32, i32
  }
  func.func @transform_9(%arg0: i32) -> (i32, i32) {
    %c0_i32 = arith.constant 0 : i32
    %c0_i32_0 = arith.constant 0 : i32
    %c0_i32_1 = arith.constant 0 : i32
    return %c0_i32, %c0_i32_0 : i32, i32
  }
  func.func @transform_10(%arg0: i32) -> (i32, i32) {
    %c0_i32 = arith.constant 0 : i32
    %c0_i32_0 = arith.constant 0 : i32
    return %arg0, %c0_i32 : i32, i32
  }
  func.func @transform_11(%arg0: i32) -> (i32, i32) {
    %c0_i32 = arith.constant 0 : i32
    %c0_i32_0 = arith.constant 0 : i32
    return %arg0, %c0_i32 : i32, i32
  }
}

</mosaic_0001>

<bundles_post_ra>
// kernel: tpu_custom_call.1
= control target key start
LH: loop header
LB: loop body
LE: loop exit
PB: predicated region body
PF: predicated region fallthrough
CT: control target
= control target key end

     0   :  { %17 = vsyncpa [#allocation3], 0  ;;  %s934_s0 = inlined_call_operand.hbm [shape: f32[8,128], index: 0, kind: input, shape index: {}]   ;;  %s935_s1 = inlined_call_operand.hbm [shape: f32[8,128], index: 1, kind: input, shape index: {}]   ;;  %s936_s2 = inlined_call_operand.hbm [shape: f32[128,384], index: 2, kind: input, shape index: {}]   ;;  %s937_s3 = inlined_call_operand.hbm [shape: f32[128,384], index: 3, kind: input, shape index: {}]   ;;  %s938_s4 = inlined_call_operand.vmem [shape: f32[1,384], index: 4, kind: input, shape index: {}]   ;;  %s939_s5 = inlined_call_operand.hbm [shape: f32[1,384], index: 5, kind: input, shape index: {}]   ;;  %s940_s6 = inlined_call_operand.hbm [shape: f32[128,128], index: 6, kind: input, shape index: {}]   ;;  %s941_s7 = inlined_call_operand.vmem [shape: f32[1,128], index: 7, kind: input, shape index: {}]   ;;  %s942_s8 = inlined_call_operand.hbm [shape: f32[128,128], index: 8, kind: input, shape index: {}]   ;;  %s943_s9 = inlined_call_operand.vmem [shape: f32[1,128], index: 9, kind: input, shape index: {}]   ;;  %s944_s10 = inlined_call_operand.hbm [shape: f32[8,128], index: 10, kind: output, shape index: {0}]   ;;  %s945_s11 = inlined_call_operand.hbm [shape: f32[8,128], index: 11, kind: output, shape index: {1}]  }
   0x1   :  { %18 = vsyncpa [#allocation6], 0 }
   0x2   :  { %19 = vsyncpa [#allocation9], 0 }
   0x3   :  { %20 = vsyncpa [#allocation12], 0 }
   0x4   :  { %21 = vsyncpa [#allocation4], 0  ;;  %s39_s19 = sshll.u32 %s935_s1, 4  ;;  %s40_s19 = int_to_ptr.hbm [resolvable:$true] %s39_s19 }
   0x5   :  { %22 = vsyncpa [#allocation16], 0  ;;  %s798_s20 = smov [#allocation5]   ;;  %s62_s24 = sshll.u32 %s937_s3, 4  ;;  %s63_s24 = int_to_ptr.hbm [resolvable:$true] %s62_s24 }
   0x6   :  { %s41_s21 = sshll.u32 %s798_s20, 4  ;;  %s799_s25 = smov [#allocation8]   ;;  %s42_s21 = int_to_ptr.vmem [resolvable:$true] %s41_s21 }
   0x7   :  { %44 = dma.hbm_to_vmem [thread:$0]  %s40_s19, 128, %s42_s21, [#allocation6]  }
   0x8   :  { %s64_s26 = sshll.u32 %s799_s25, 4  ;;  %s88_s29 = sshll.u32 %s940_s6, 4  ;;  %s65_s26 = int_to_ptr.vmem [resolvable:$true] %s64_s26  ;;  %s89_s29 = int_to_ptr.hbm [resolvable:$true] %s88_s29 }
   0x9   :  { %s800_s1 = smov 384   ;;  %s801_s30 = smov 24  }
   0xa   :  { %70 = dma.hbm_to_vmem [thread:$0]  %s63_s24, 6144, %s65_s26, [#allocation9], %s800_s1, %s800_s1, %s801_s30  }
   0xb   :  { %s802_s12 = smov [#allocation11]   ;;  %s28_s16 = sshll.u32 %s934_s0, 4  ;;  %s29_s16 = int_to_ptr.hbm [resolvable:$true] %s28_s16 }
   0xc   :  { %s90_s13 = sshll.u32 %s802_s12, 4  ;;  %s803_s3 = smov 128   ;;  %s91_s13 = int_to_ptr.vmem [resolvable:$true] %s90_s13 }
   0xd   :  { %s804_s17 = smov 8   ;;  %s805_s18 = smov [#allocation2]  }
   0xe   :  { %96 = dma.hbm_to_vmem [thread:$0]  %s89_s29, 2048, %s91_s13, [#allocation12], %s803_s3, %s803_s3, %s804_s17  }
   0xf   :  { %s30_s19 = sshll.u32 %s805_s18, 4  ;;  %s49_s21 = sshll.u32 %s936_s2, 4  ;;  %s31_s19 = int_to_ptr.vmem [resolvable:$true] %s30_s19  ;;  %s50_s21 = int_to_ptr.hbm [resolvable:$true] %s49_s21 }
  0x10   :  { %33 = dma.hbm_to_vmem [thread:$0]  %s29_s16, 128, %s31_s19, [#allocation3]  }
  0x11   :  { %s78_s24 = sshll.u32 %s939_s5, 4  ;;  %s806_s25 = smov [#allocation7]   ;;  %s79_s24 = int_to_ptr.hbm [resolvable:$true] %s78_s24 }
  0x12   :  { %s51_s26 = sshll.u32 %s806_s25, 4  ;;  %s807_s0 = smov [#allocation10]   ;;  %s52_s26 = int_to_ptr.vmem [resolvable:$true] %s51_s26 }
  0x13   :  { %57 = dma.hbm_to_vmem [thread:$0]  %s50_s21, 6144, %s52_s26, [#allocation6], %s800_s1, %s800_s1, %s801_s30  }
  0x14   :  { %s80_s27 = sshll.u32 %s807_s0, 4  ;;  %s103_s12 = sshll.u32 %s942_s8, 4  ;;  %s81_s27 = int_to_ptr.vmem [resolvable:$true] %s80_s27  ;;  %s104_s12 = int_to_ptr.hbm [resolvable:$true] %s103_s12 }
  0x15   :  { %83 = dma.hbm_to_vmem [thread:$0]  %s79_s24, 48, %s81_s27, [#allocation9]  }
  0x16   :  { %s808_s2 = smov [#allocation13]  }
  0x17   :  { %s105_s13 = sshll.u32 %s808_s2, 4  ;;  %s106_s13 = int_to_ptr.vmem [resolvable:$true] %s105_s13 }
  0x18   :  { %111 = dma.hbm_to_vmem [thread:$0]  %s104_s12, 2048, %s106_s13, [#allocation12], %s803_s3, %s803_s3, %s804_s17  }
  0x19   :  { %786 = dma.done.wait [#allocation3], 128  }
  0x1a   :  { %787 = vsyncadd [#allocation3], 4294967168 }
  0x1b   :  { %788 = dma.done.wait [#allocation6], 6272  }
  0x1c   :  { %789 = vsyncadd [#allocation6], 4294961024 }
  0x1d   :  { %790 = dma.done.wait [#allocation9], 6192  }
  0x1e   :  { %791 = vsyncadd [#allocation9], 4294961104 }
  0x1f   :  { %792 = dma.done.wait [#allocation12], 4096  }
  0x20   :  { %793 = vsyncadd [#allocation12], 4294963200  ;;  %v189_v0 = vld [vmem:[#allocation7 + $0x168] sm:$0xff]  ;;  %v186_v2 = vld [vmem:[#allocation7 + $0x150] sm:$0xff]  ;;  %s809_s30 = smov [#allocation15]   ;;  %s523_s3 = sshll.u32 %s945_s11, 4  ;;  %s524_s3 = int_to_ptr.hbm [resolvable:$true] %s523_s3 }
  0x21   :  { %v305_v1 = vld [vmem:[#allocation8 + $0x168] sm:$0xff]  ;;  %200 = vmatpush.msra.mxu0 %v189_v0  ;;  %v302_v3 = vld [vmem:[#allocation8 + $0x150] sm:$0xff]  ;;  %v183_v4 = vld [vmem:[#allocation7 + $0x138] sm:$0xff]  ;;  %s521_s14 = sshll.u32 %s809_s30, 4  ;;  %s810_s19 = smov [#allocation14]   ;;  %s522_s14 = int_to_ptr.vmem [resolvable:$true] %s521_s14 }
  0x22   :  { %316 = vmatpush.msra.mxu3 %v305_v1  ;;  %v299_v5 = vld [vmem:[#allocation8 + $0x138] sm:$0xff]  ;;  %v190_v6 = vld [vmem:[#allocation7 + $0x170] sm:$0xff]  ;;  %v180_v8 = vld [vmem:[#allocation7 + $0x120] sm:$0xff]  ;;  %s512_s21 = sshll.u32 %s944_s10, 4  ;;  %s513_s21 = int_to_ptr.hbm [resolvable:$true] %s512_s21 }
  0x23   :  { %201 = vmatpush.msra.mxu0 %v186_v2  ;;  %v187_v7 = vld [vmem:[#allocation7 + $0x158] sm:$0xff]  ;;  %220 = vmatpush.msra.mxu1 %v190_v6  ;;  %v296_v9 = vld [vmem:[#allocation8 + $0x120] sm:$0xff]  ;;  %v177_v11 = vld [vmem:[#allocation7 + $0x108] sm:$0xff] }
  0x24   :  { %317 = vmatpush.msra.mxu3 %v302_v3  ;;  %v184_v10 = vld [vmem:[#allocation7 + $0x140] sm:$0xff]  ;;  %v293_v12 = vld [vmem:[#allocation8 + $0x108] sm:$0xff]  ;;  %v174_v14 = vld [vmem:[#allocation7 + $0xf0] sm:$0xff] }
  0x25   :  { %202 = vmatpush.msra.mxu0 %v183_v4  ;;  %221 = vmatpush.msra.mxu1 %v187_v7  ;;  %v181_v13 = vld [vmem:[#allocation7 + $0x128] sm:$0xff]  ;;  %v290_v15 = vld [vmem:[#allocation8 + $0xf0] sm:$0xff]  ;;  %v171_v17 = vld [vmem:[#allocation7 + $0xd8] sm:$0xff] }
  0x26   :  { %318 = vmatpush.msra.mxu3 %v299_v5  ;;  %v178_v16 = vld [vmem:[#allocation7 + $0x110] sm:$0xff]  ;;  %v287_v18 = vld [vmem:[#allocation8 + $0xd8] sm:$0xff]  ;;  %v168_v20 = vld [vmem:[#allocation7 + $0xc0] sm:$0xff] }
  0x27   :  { %203 = vmatpush.msra.mxu0 %v180_v8  ;;  %222 = vmatpush.msra.mxu1 %v184_v10  ;;  %v175_v19 = vld [vmem:[#allocation7 + $0xf8] sm:$0xff]  ;;  %v284_v21 = vld [vmem:[#allocation8 + $0xc0] sm:$0xff]  ;;  %v165_v23 = vld [vmem:[#allocation7 + $0xa8] sm:$0xff] }
  0x28   :  { %319 = vmatpush.msra.mxu3 %v296_v9  ;;  %v172_v22 = vld [vmem:[#allocation7 + $0xe0] sm:$0xff]  ;;  %v281_v24 = vld [vmem:[#allocation8 + $0xa8] sm:$0xff]  ;;  %v162_v26 = vld [vmem:[#allocation7 + $0x90] sm:$0xff] }
  0x29   :  { %204 = vmatpush.msra.mxu0 %v177_v11  ;;  %223 = vmatpush.msra.mxu1 %v181_v13  ;;  %v169_v25 = vld [vmem:[#allocation7 + $0xc8] sm:$0xff]  ;;  %v278_v27 = vld [vmem:[#allocation8 + $0x90] sm:$0xff]  ;;  %v191_v28 = vld [vmem:[#allocation7 + $0x178] sm:$0xff] }
  0x2a   :  { %320 = vmatpush.msra.mxu3 %v293_v12  ;;  %v166_v29 = vld [vmem:[#allocation7 + $0xb0] sm:$0xff]  ;;  %v188_v30 = vld [vmem:[#allocation7 + $0x160] sm:$0xff]  ;;  %v159_v31 = vld [vmem:[#allocation7 + $0x78] sm:$0xff]  ;;  %240 = vmatpush.msra.mxu2 %v191_v28 }
  0x2b   :  { %205 = vmatpush.msra.mxu0 %v174_v14  ;;  %224 = vmatpush.msra.mxu1 %v178_v16  ;;  %v275_v32 = vld [vmem:[#allocation8 + $0x78] sm:$0xff]  ;;  %v185_v34 = vld [vmem:[#allocation7 + $0x148] sm:$0xff]  ;;  %v156_v35 = vld [vmem:[#allocation7 + $0x60] sm:$0xff] }
  0x2c   :  { %321 = vmatpush.msra.mxu3 %v290_v15  ;;  %v163_v33 = vld [vmem:[#allocation7 + $0x98] sm:$0xff]  ;;  %v272_v36 = vld [vmem:[#allocation8 + $0x60] sm:$0xff]  ;;  %241 = vmatpush.msra.mxu2 %v188_v30  ;;  %v182_v38 = vld [vmem:[#allocation7 + $0x130] sm:$0xff] }
  0x2d   :  { %206 = vmatpush.msra.mxu0 %v171_v17  ;;  %225 = vmatpush.msra.mxu1 %v175_v19  ;;  %v160_v37 = vld [vmem:[#allocation7 + $0x80] sm:$0xff]  ;;  %v153_v39 = vld [vmem:[#allocation7 + $0x48] sm:$0xff]  ;;  %v179_v42 = vld [vmem:[#allocation7 + $0x118] sm:$0xff] }
  0x2e   :  { %322 = vmatpush.msra.mxu3 %v287_v18  ;;  %v269_v40 = vld [vmem:[#allocation8 + $0x48] sm:$0xff]  ;;  %242 = vmatpush.msra.mxu2 %v185_v34  ;;  %v150_v43 = vld [vmem:[#allocation7 + $0x30] sm:$0xff]  ;;  %v176_v46 = vld [vmem:[#allocation7 + $0x100] sm:$0xff] }
  0x2f   :  { %207 = vmatpush.msra.mxu0 %v168_v20  ;;  %226 = vmatpush.msra.mxu1 %v172_v22  ;;  %v157_v41 = vld [vmem:[#allocation7 + $0x68] sm:$0xff]  ;;  %v266_v44 = vld [vmem:[#allocation8 + $0x30] sm:$0xff]  ;;  %v147_v47 = vld [vmem:[#allocation7 + $0x18] sm:$0xff] }
  0x30   :  { %323 = vmatpush.msra.mxu3 %v284_v21  ;;  %243 = vmatpush.msra.mxu2 %v182_v38  ;;  %v154_v45 = vld [vmem:[#allocation7 + $0x50] sm:$0xff]  ;;  %v263_v48 = vld [vmem:[#allocation8 + $0x18] sm:$0xff]  ;;  %v173_v50 = vld [vmem:[#allocation7 + $0xe8] sm:$0xff] }
  0x31   :  { %208 = vmatpush.msra.mxu0 %v165_v23  ;;  %227 = vmatpush.msra.mxu1 %v169_v25  ;;  %v151_v49 = vld [vmem:[#allocation7 + $0x38] sm:$0xff]  ;;  %v144_v51 = vld [vmem:[#allocation7] sm:$0xff]  ;;  %v306_v54 = vld [vmem:[#allocation8 + $0x170] sm:$0xff] }
  0x32   :  { %324 = vmatpush.msra.mxu3 %v281_v24  ;;  %244 = vmatpush.msra.mxu2 %v179_v42  ;;  %v260_v52 = vld [vmem:[#allocation8] sm:$0xff]  ;;  %v892_v53 = vld [vmem:[#allocation5] sm:$0xff]  ;;  %v894_v56 = vld [vmem:[#allocation2] sm:$0xff] }
  0x33   :  { %209 = vmatpush.msra.mxu0 %v162_v26  ;;  %228 = vmatpush.msra.mxu1 %v166_v29  ;;  %v148_v55 = vld [vmem:[#allocation7 + $0x20] sm:$0xff]  ;;  %v303_v57 = vld [vmem:[#allocation8 + $0x158] sm:$0xff]  ;;  %v170_v58 = vld [vmem:[#allocation7 + $0xd0] sm:$0xff] }
  0x34   :  { %325 = vmatpush.msra.mxu3 %v278_v27  ;;  %245 = vmatpush.msra.mxu2 %v176_v46  ;;  %v145_v59 = vld [vmem:[#allocation7 + $0x8] sm:$0xff]  ;;  %v300_v60 = vld [vmem:[#allocation8 + $0x140] sm:$0xff]  ;;  %v307_v61 = vld [vmem:[#allocation8 + $0x178] sm:$0xff] }
  0x35   :  { %210 = vmatpush.msra.mxu0 %v159_v31  ;;  %229 = vmatpush.msra.mxu1 %v163_v33  ;;  %v167_v62 = vld [vmem:[#allocation7 + $0xb8] sm:$0xff]  ;;  %v297_v63 = vld [vmem:[#allocation8 + $0x128] sm:$0xff]  ;;  %v304_v0 = vld [vmem:[#allocation8 + $0x160] sm:$0xff] }
  0x36   :  { %326 = vmatpush.msra.mxu3 %v275_v32  ;;  %246 = vmatpush.msra.mxu2 %v173_v50  ;;  %v164_v1 = vld [vmem:[#allocation7 + $0xa0] sm:$0xff]  ;;  %v294_v2 = vld [vmem:[#allocation8 + $0x110] sm:$0xff]  ;;  %v301_v3 = vld [vmem:[#allocation8 + $0x148] sm:$0xff] }
  0x37   :  { %211 = vmatpush.msra.mxu0 %v156_v35  ;;  %230 = vmatpush.msra.mxu1 %v160_v37  ;;  %v161_v4 = vld [vmem:[#allocation7 + $0x88] sm:$0xff]  ;;  %v291_v5 = vld [vmem:[#allocation8 + $0xf8] sm:$0xff]  ;;  %v298_v6 = vld [vmem:[#allocation8 + $0x130] sm:$0xff] }
  0x38   :  { %327 = vmatpush.msra.mxu3 %v272_v36  ;;  %247 = vmatpush.msra.mxu2 %v170_v58  ;;  %v158_v7 = vld [vmem:[#allocation7 + $0x70] sm:$0xff]  ;;  %v288_v8 = vld [vmem:[#allocation8 + $0xe0] sm:$0xff]  ;;  %v295_v9 = vld [vmem:[#allocation8 + $0x118] sm:$0xff] }
  0x39   :  { %212 = vmatpush.msra.mxu0 %v153_v39  ;;  %231 = vmatpush.msra.mxu1 %v157_v41  ;;  %v155_v10 = vld [vmem:[#allocation7 + $0x58] sm:$0xff]  ;;  %v285_v11 = vld [vmem:[#allocation8 + $0xc8] sm:$0xff]  ;;  %v292_v12 = vld [vmem:[#allocation8 + $0x100] sm:$0xff] }
  0x3a   :  { %328 = vmatpush.msra.mxu3 %v269_v40  ;;  %248 = vmatpush.msra.mxu2 %v167_v62  ;;  %v152_v13 = vld [vmem:[#allocation7 + $0x40] sm:$0xff]  ;;  %v282_v14 = vld [vmem:[#allocation8 + $0xb0] sm:$0xff]  ;;  %v289_v15 = vld [vmem:[#allocation8 + $0xe8] sm:$0xff] }
  0x3b   :  { %213 = vmatpush.msra.mxu0 %v150_v43  ;;  %232 = vmatpush.msra.mxu1 %v154_v45  ;;  %v149_v16 = vld [vmem:[#allocation7 + $0x28] sm:$0xff]  ;;  %v279_v17 = vld [vmem:[#allocation8 + $0x98] sm:$0xff]  ;;  %v286_v18 = vld [vmem:[#allocation8 + $0xd0] sm:$0xff] }
  0x3c   :  { %329 = vmatpush.msra.mxu3 %v266_v44  ;;  %249 = vmatpush.msra.mxu2 %v164_v1  ;;  %v146_v19 = vld [vmem:[#allocation7 + $0x10] sm:$0xff]  ;;  %v276_v20 = vld [vmem:[#allocation8 + $0x80] sm:$0xff]  ;;  %v283_v21 = vld [vmem:[#allocation8 + $0xb8] sm:$0xff] }
  0x3d   :  { %214 = vmatpush.msra.mxu0 %v147_v47  ;;  %233 = vmatpush.msra.mxu1 %v151_v49  ;;  %v273_v22 = vld [vmem:[#allocation8 + $0x68] sm:$0xff]  ;;  %v280_v23 = vld [vmem:[#allocation8 + $0xa0] sm:$0xff]  ;;  %v270_v24 = vld [vmem:[#allocation8 + $0x50] sm:$0xff] }
  0x3e   :  { %330 = vmatpush.msra.mxu3 %v263_v48  ;;  %250 = vmatpush.msra.mxu2 %v161_v4  ;;  %v277_v25 = vld [vmem:[#allocation8 + $0x88] sm:$0xff]  ;;  %v267_v26 = vld [vmem:[#allocation8 + $0x38] sm:$0xff]  ;;  %v274_v27 = vld [vmem:[#allocation8 + $0x70] sm:$0xff] }
  0x3f   :  { %215 = vmatpush.msra.mxu0 %v144_v51  ;;  %234 = vmatpush.msra.mxu1 %v148_v55  ;;  %v264_v28 = vld [vmem:[#allocation8 + $0x20] sm:$0xff]  ;;  %v271_v29 = vld [vmem:[#allocation8 + $0x58] sm:$0xff]  ;;  %v261_v30 = vld [vmem:[#allocation8 + $0x8] sm:$0xff] }
  0x40   :  { %331 = vmatpush.msra.mxu3 %v260_v52  ;;  %216 = vmatmul.f32.vlgmr.msra.gmra.mxu0 %v894_v56  ;;  %v268_v31 = vld [vmem:[#allocation8 + $0x40] sm:$0xff]  ;;  %v265_v32 = vld [vmem:[#allocation8 + $0x28] sm:$0xff]  ;;  %v262_v33 = vld [vmem:[#allocation8 + $0x10] sm:$0xff] }
  0x41   :  { %332 = vmatmul.f32.vlgmr.msra.gmra.mxu3 %v892_v53  ;;  %336 = vmatpush.msrb.mxu0 %v306_v54  ;;  %v905_v34 = vld [vmem:[%s938_s4] sm:$0x7]  ;;  %v907_v35 = vld [vmem:[#allocation10] sm:$0x7]  ;;  %v436_v42 = vld [vmem:[#allocation11 + $0x70] sm:$0xff] }
  0x42   :  { %235 = vmatpush.msra.mxu1 %v145_v59  ;;  %251 = vmatpush.msra.mxu2 %v158_v7  ;;  %v194_v36 = vperm.slane %v905_v34, 0  ;;  %v310_v38 = vperm.slane %v907_v35, 0  ;;  %v437_v39 = vld [vmem:[#allocation11 + $0x78] sm:$0xff]  ;;  %v435_v44 = vld [vmem:[#allocation11 + $0x68] sm:$0xff]  ;;  %v434_v46 = vld [vmem:[#allocation11 + $0x60] sm:$0xff]  ;;  %v195_v59 = vperm.slane %v905_v34, 1 }
  0x43   :  { %337 = vmatpush.msrb.mxu0 %v303_v57  ;;  %236 = vmatmul.f32.vlgmr.msra.gmra.mxu1 %v894_v56  ;;  %v433_v48 = vld [vmem:[#allocation11 + $0x58] sm:$0xff]  ;;  %v432_v49 = vld [vmem:[#allocation11 + $0x50] sm:$0xff]  ;;  %v431_v50 = vld [vmem:[#allocation11 + $0x48] sm:$0xff] }
  0x44   :  { %356 = vmatpush.msrb.mxu1 %v307_v61  ;;  %252 = vmatpush.msra.mxu2 %v155_v10  ;;  %v430_v51 = vld [vmem:[#allocation11 + $0x40] sm:$0xff]  ;;  %v429_v55 = vld [vmem:[#allocation11 + $0x38] sm:$0xff]  ;;  %v427_v57 = vld [vmem:[#allocation11 + $0x28] sm:$0xff] }
  0x45   :  { %338 = vmatpush.msrb.mxu0 %v300_v60  ;;  %v426_v58 = vld [vmem:[#allocation11 + $0x20] sm:$0xff]  ;;  %v425_v60 = vld [vmem:[#allocation11 + $0x18] sm:$0xff] }
  0x46   :  { %357 = vmatpush.msrb.mxu1 %v304_v0  ;;  %253 = vmatpush.msra.mxu2 %v152_v13  ;;  %v424_v0 = vld [vmem:[#allocation11 + $0x10] sm:$0xff]  ;;  %v422_v7 = vld [vmem:[#allocation11] sm:$0xff] }
  0x47   :  { %339 = vmatpush.msrb.mxu0 %v297_v63  ;;  %v311_v63 = vperm.slane %v907_v35, 1 }
  0x48   :  { %358 = vmatpush.msrb.mxu1 %v301_v3  ;;  %254 = vmatpush.msra.mxu2 %v149_v16  ;;  %v423_v3 = vld [vmem:[#allocation11 + $0x8] sm:$0xff]  ;;  %v477_v16 = vld [vmem:[#allocation13 + $0x70] sm:$0xff] }
  0x49   :  { %340 = vmatpush.msrb.mxu0 %v294_v2 }
  0x4a   :  { %359 = vmatpush.msrb.mxu1 %v298_v6  ;;  %255 = vmatpush.msra.mxu2 %v146_v19 }
  0x4b   :  { %341 = vmatpush.msrb.mxu0 %v291_v5  ;;  %256 = vmatmul.f32.vlgmr.msra.gmra.mxu2 %v894_v56  ;;  %v428_v56 = vld [vmem:[#allocation11 + $0x30] sm:$0xff] }
  0x4c   :  { %360 = vmatpush.msrb.mxu1 %v295_v9  ;;  %442 = vmatpush.msrb.mxu2 %v437_v39 }
  0x4d   :  { %342 = vmatpush.msrb.mxu0 %v288_v8 }
  0x4e   :  { %361 = vmatpush.msrb.mxu1 %v292_v12  ;;  %443 = vmatpush.msrb.mxu2 %v436_v42 }
  0x4f   :  { %343 = vmatpush.msrb.mxu0 %v285_v11 }
  0x50   :  { %362 = vmatpush.msrb.mxu1 %v289_v15  ;;  %444 = vmatpush.msrb.mxu2 %v435_v44  ;;  %v478_v15 = vld [vmem:[#allocation13 + $0x78] sm:$0xff] }
  0x51   :  { %344 = vmatpush.msrb.mxu0 %v282_v14  ;;  %483 = vmatpush.msrb.mxu3 %v478_v15 }
  0x52   :  { %363 = vmatpush.msrb.mxu1 %v286_v18  ;;  %445 = vmatpush.msrb.mxu2 %v434_v46 }
  0x53   :  { %345 = vmatpush.msrb.mxu0 %v279_v17  ;;  %v312_v17 = vperm.slane %v907_v35, 2  ;;  %484 = vmatpush.msrb.mxu3 %v477_v16  ;;  %v471_v35 = vld [vmem:[#allocation13 + $0x40] sm:$0xff] }
  0x54   :  { %364 = vmatpush.msrb.mxu1 %v283_v21  ;;  %446 = vmatpush.msrb.mxu2 %v433_v48 }
  0x55   :  { %346 = vmatpush.msrb.mxu0 %v276_v20  ;;  %v476_v20 = vld [vmem:[#allocation13 + $0x68] sm:$0xff] }
  0x56   :  { %365 = vmatpush.msrb.mxu1 %v280_v23  ;;  %447 = vmatpush.msrb.mxu2 %v432_v49 }
  0x57   :  { %347 = vmatpush.msrb.mxu0 %v273_v22  ;;  %v475_v22 = vld [vmem:[#allocation13 + $0x60] sm:$0xff]  ;;  %485 = vmatpush.msrb.mxu3 %v476_v20 }
  0x58   :  { %366 = vmatpush.msrb.mxu1 %v277_v25  ;;  %448 = vmatpush.msrb.mxu2 %v431_v50 }
  0x59   :  { %348 = vmatpush.msrb.mxu0 %v270_v24  ;;  %v196_v24 = vperm.slane %v905_v34, 2  ;;  %486 = vmatpush.msrb.mxu3 %v475_v22  ;;  %v469_v34 = vld [vmem:[#allocation13 + $0x30] sm:$0xff] }
  0x5a   :  { %367 = vmatpush.msrb.mxu1 %v274_v27  ;;  %449 = vmatpush.msrb.mxu2 %v430_v51  ;;  %v474_v27 = vld [vmem:[#allocation13 + $0x58] sm:$0xff] }
  0x5b   :  { %349 = vmatpush.msrb.mxu0 %v267_v26  ;;  %487 = vmatpush.msrb.mxu3 %v474_v27 }
  0x5c   :  { %368 = vmatpush.msrb.mxu1 %v271_v29  ;;  %450 = vmatpush.msrb.mxu2 %v429_v55  ;;  %v473_v29 = vld [vmem:[#allocation13 + $0x50] sm:$0xff]  ;;  %v466_v55 = vld [vmem:[#allocation13 + $0x18] sm:$0xff] }
  0x5d   :  { %350 = vmatpush.msrb.mxu0 %v264_v28  ;;  %488 = vmatpush.msrb.mxu3 %v473_v29 }
  0x5e   :  { %369 = vmatpush.msrb.mxu1 %v268_v31  ;;  %451 = vmatpush.msrb.mxu2 %v428_v56  ;;  %v465_v56 = vld [vmem:[#allocation13 + $0x10] sm:$0xff] }
  0x5f   :  { %351 = vmatpush.msrb.mxu0 %v261_v30 }
  0x60   :  { %352 = vmatmul.f32.vlgmr.msrb.gmra.mxu0 %v892_v53  ;;  %370 = vmatpush.msrb.mxu1 %v265_v32 }
  0x61   :  { %452 = vmatpush.msrb.mxu2 %v427_v57  ;;  %v464_v57 = vld [vmem:[#allocation13 + $0x8] sm:$0xff] }
  0x62   :  { %371 = vmatpush.msrb.mxu1 %v262_v33  ;;  %v472_v33 = vld [vmem:[#allocation13 + $0x48] sm:$0xff] }
  0x63   :  { %372 = vmatmul.f32.vlgmr.msrb.gmra.mxu1 %v892_v53  ;;  %453 = vmatpush.msrb.mxu2 %v426_v58  ;;  %v463_v58 = vld [vmem:[#allocation13] sm:$0xff] }
  0x64   :  { %489 = vmatpush.msrb.mxu3 %v472_v33 }
  0x65   :  { %454 = vmatpush.msrb.mxu2 %v425_v60 }
  0x66   :  { %490 = vmatpush.msrb.mxu3 %v471_v35 }
  0x67   :  { %455 = vmatpush.msrb.mxu2 %v424_v0 }
  0x69   :  { %456 = vmatpush.msrb.mxu2 %v423_v3 }
  0x6b   :  { %457 = vmatpush.msrb.mxu2 %v422_v7 }
  0xbd   :  { %v217_v37 = vpop.f32.mrf.mxu0 }
  0xbe   :  { %v218_v40 = vadd.f32 %v217_v37, %v194_v36  ;;  %v470_v37 = vld [vmem:[#allocation13 + $0x38] sm:$0xff] }
  0xbf   :  { %491 = vmatpush.msrb.mxu3 %v470_v37 }
  0xc0   :  { %v237_v62 = vpop.f32.mrf.mxu1 }
  0xc1   :  { %v238_v2 = vadd.f32 %v237_v62, %v195_v59  ;;  %492 = vmatpush.msrb.mxu3 %v469_v34  ;;  %v556_v59 = vld [vmem:[%s941_s7] ss:$0 sm:$0xff]  ;;  %s510_s7 = sshll.u32 %s810_s19, 4  ;;  %s511_s7 = int_to_ptr.vmem [resolvable:$true] %s510_s7 }
  0xc2   :  { %v557_v62 = vld [vmem:[%s943_s9] ss:$0 sm:$0xff] }
  0xc4   :  { %v333_v41 = vpop.f32.mrf.mxu3 }
  0xc5   :  { %v334_v43 = vadd.f32 %v333_v41, %v310_v38 }
  0xc7   :  { %v376_v45 = vadd.f32 %v334_v43, %v218_v40  ;;  %v468_v40 = vld [vmem:[#allocation13 + $0x28] sm:$0xff] }
  0xc8   :  { %493 = vmatpush.msrb.mxu3 %v468_v40 }
  0xc9   :  { %v541_v47 = vmul.f32 -1.442695, %v376_v45 }
  0xcb   :  { %558 = vpow2.f32 %v541_v47 }
  0xce   :  { %v257_v26 = vpop.f32.mrf.mxu2 }
  0xcf   :  { %v258_v32 = vadd.f32 %v257_v26, %v196_v24 }
  0xd1   :  { %v559_v52 = vpop.eup %558 }
  0xd2   :  { %v380_v54 = vadd.f32 1.0, %v559_v52 }
  0xd4   :  { %560 = vrcp.f32 %v380_v54  ;;  %vm386_vm0 = vweird.f32 %v380_v54  ;;  %v392_v10 = vand.u32 2147483648, %v380_v54  ;;  %v390_v12 = vand.u32 2147483647, %v380_v54 }
  0xd6   :  { %v393_v19 = vor.u32 1.1754944e-38, %v392_v10  ;;  %vm391_vm3 = vcmp.eq.f32.partialorder %v390_v12, 8.507059e+37 }
  0xda   :  { %v561_v61 = vpop.eup %560 }
  0xdb   :  { %v382_v1 = vmul.f32 %v561_v61, %v380_v54  ;;  %vm387_vm1 = vweird.f32 %v561_v61  ;;  %v467_v54 = vld [vmem:[#allocation13 + $0x20] sm:$0xff] }
  0xdc   :  { %vm913_vm2 = vmor %vm386_vm0, %vm387_vm1  ;;  %494 = vmatpush.msrb.mxu3 %v467_v54 }
  0xdd   :  { %v353_v4 = vpop.f32.mrf.mxu0  ;;  %v383_v5 = vsub.f32 1.0, %v382_v1 }
  0xde   :  { %v354_v6 = vadd.f32 %v353_v4, %v311_v63  ;;  %495 = vmatpush.msrb.mxu3 %v466_v55 }
  0xdf   :  { %v384_v8 = vmul.f32 %v561_v61, %v383_v5 }
  0xe0   :  { %v396_v9 = vadd.f32 %v354_v6, %v238_v2  ;;  %v373_v18 = vpop.f32.mrf.mxu1  ;;  %496 = vmatpush.msrb.mxu3 %v465_v56 }
  0xe1   :  { %v385_v11 = vadd.f32 %v561_v61, %v384_v8  ;;  %v374_v23 = vadd.f32 %v373_v18, %v312_v17 }
  0xe2   :  { %v542_v13 = vmul.f32 -1.442695, %v396_v9  ;;  %497 = vmatpush.msrb.mxu3 %v464_v57 }
  0xe3   :  { %v389_v21 = vsel %vm913_vm2, %v561_v61, %v385_v11 }
  0xe4   :  { %562 = vpow2.f32 %v542_v13  ;;  %v394_v25 = vsel %vm391_vm3, %v393_v19, %v389_v21  ;;  %498 = vmatpush.msrb.mxu3 %v463_v58 }
  0xe5   :  { %v416_v31 = vmul.f32 %v394_v25, %v374_v23 }
  0xe7   :  { %v417_v36 = vadd.f32 %v416_v31, %v258_v32 }
  0xea   :  { %v563_v28 = vpop.eup %562 }
  0xeb   :  { %v400_v30 = vadd.f32 1.0, %v563_v28 }
  0xed   :  { %564 = vrcp.f32 %v400_v30  ;;  %v412_v42 = vand.u32 2147483648, %v400_v30  ;;  %v410_v44 = vand.u32 2147483647, %v400_v30  ;;  %vm406_vm5 = vweird.f32 %v400_v30 }
  0xee   :  { %566 = vtanh.f32 %v417_v36 }
  0xef   :  { %v413_v47 = vor.u32 1.1754944e-38, %v412_v42  ;;  %vm411_vm7 = vcmp.eq.f32.partialorder %v410_v44, 8.507059e+37 }
  0xf3   :  { %v565_v38 = vpop.eup %564 }
  0xf4   :  { %v402_v39 = vmul.f32 %v565_v38, %v400_v30  ;;  %vm407_vm4 = vweird.f32 %v565_v38  ;;  %v567_v45 = vpop.eup %566 }
  0xf5   :  { %vm408_vm6 = vmor %vm406_vm5, %vm407_vm4  ;;  %v419_v49 = vsub.f32 %v892_v53, %v567_v45 }
  0xf6   :  { %v403_v41 = vsub.f32 1.0, %v402_v39 }
  0xf8   :  { %v404_v43 = vmul.f32 %v565_v38, %v403_v41 }
  0xfa   :  { %v405_v46 = vadd.f32 %v565_v38, %v404_v43 }
  0xfc   :  { %v409_v48 = vsel %vm408_vm6, %v565_v38, %v405_v46 }
  0xfd   :  { %v414_v50 = vsel %vm411_vm7, %v413_v47, %v409_v48 }
  0xfe   :  { %v420_v51 = vmul.f32 %v419_v49, %v414_v50 }
 0x100   :  { %v421_v52 = vadd.f32 %v567_v45, %v420_v51 }
 0x102   :  { %458 = vmatmul.f32.vlgmr.msrb.gmra.mxu2 %v421_v52  ;;  %503 = vst [vmem:[#allocation15] sm:$0xff] %v421_v52 }
 0x103   :  { %526 = dma.vmem_to_hbm [thread:$0]  %s522_s14, 128, %s524_s3, [#allocation16]  }
 0x185   :  { %v459_v53 = vpop.f32.mrf.mxu2 }
 0x186   :  { %v460_v60 = vadd.f32 %v556_v59, %v459_v53 }
 0x188   :  { %568 = vtanh.f32 %v460_v60 }
 0x18e   :  { %v569_v61 = vpop.eup %568 }
 0x18f   :  { %499 = vmatmul.f32.vlgmr.msrb.gmra.mxu3 %v569_v61 }
 0x212   :  { %v500_v63 = vpop.f32.mrf.mxu3 }
 0x213   :  { %v501_v0 = vadd.f32 %v557_v62, %v500_v63 }
 0x215   :  { %504 = vst [vmem:[#allocation14] sm:$0xff] %v501_v0 }
 0x216   :  { %515 = dma.vmem_to_hbm [thread:$0]  %s511_s7, 128, %s513_s21, [#allocation4]  }
 0x217   :  { %794 = dma.done.wait [#allocation4], 128  }
 0x218   :  { %795 = vsyncadd [#allocation4], 4294967168 }
 0x219   :  { %796 = dma.done.wait [#allocation16], 128  }
 0x21a   :  { %797 = vsyncadd [#allocation16], 4294967168 }
 0x21b   :  { %535 = vsyncpa [#allocation3], 1 }
 0x21c   :  { %536 = vsyncpa [#allocation6], 1 }
 0x21d   :  { %537 = vsyncpa [#allocation9], 1 }
 0x21e   :  { %538 = vsyncpa [#allocation12], 1 }
 0x21f   :  { %539 = vsyncpa [#allocation4], 1 }
 0x220   :  { %540 = vsyncpa [#allocation16], 1 }

</bundles_post_ra>
